<compile_context>
chip_gen: v7x
topology: tpu7x:2x2x1
jax: 0.10.0
libtpu: 0.0.40
codegen_flags: <defaults>
</compile_context>

<pallas_src>
import math

import jax
import jax.numpy as jnp
from jax.experimental import pallas as pl
from jax.experimental.pallas import tpu as pltpu

_MAX_ROW_TILE = 1024     # (1024, 512) f32 block = 2 MiB
_MIN_GRID_STEPS = 8      # keep both v7x TCs + the DMA pipeline fed


def _round_up(a, b):
    return -(-a // b) * b


def _choose_slab(total):
    """Pick (lanes, rows, pad) for a lane-dense 2-D slab.

    Preference:
      1. lanes in {512,256,128} with rows = total//lanes a multiple of 16
         -> no pad, sublane-aligned half split.
      2. lanes dividing total with rows >= 16 (or rows even for tiny inputs)
         -> no pad, last grid block may be partial.
      3. otherwise pad the flat array to a 16-row multiple at lanes=128
         (at most ~2K elements — negligible vs. the old pad-to-row_tile).
    """
    best = None
    for lanes in (512, 256, 128):
        if total % lanes:
            continue
        rows = total // lanes
        if rows % 16 == 0:
            return lanes, rows, 0
        if best is None and (rows >= 16 or rows % 2 == 0):
            best = (lanes, rows, 0)
    if best is not None:
        return best
    lanes = 128
    rows = max(16, _round_up(-(-total // lanes), 16))
    return lanes, rows, rows * lanes - total


def _pick_row_tile(rows):
    """Block rows: multiple of 16 (sublane-aligned half split), capped so the
    1-D grid has ~_MIN_GRID_STEPS steps for mid/large inputs."""
    if rows <= 16:
        return rows                      # tiny input: single full-dim block
    rt = _round_up(-(-rows // _MIN_GRID_STEPS), 16)
    return max(16, min(_MAX_ROW_TILE, rt))


def _uniform_from_bits(bits_u32, *, avoid_zero):
    """uint32 PRNG bits -> f32 uniforms in [0,1) (or strictly (0,1))."""
    # Mantissa bit-trick: OR the top 23 random bits under the exponent of 1.0f
    # -> [1,2), subtract 1.  The +2^-24 keeps u strictly positive for log();
    # the sub-ulp distribution bias is negligible for ProbAct noise.
    mant = bits_u32 >> 9
    f12 = pltpu.bitcast(mant | jnp.uint32(0x3F800000), jnp.float32)
    u = f12 - jnp.float32(1.0)
    if avoid_zero:
        u = u + jnp.float32(2.0 ** -24)
    return u


def _make_sigma_prng_kernel(compute_dtype):
    """compute_dtype: bf16 on chips with a native bf16 EUP (v6e/v7x), else f32."""

    def kernel(seed_ref, w_ref, x_ref, o_ref):
        # Seed once per grid program; program_id keeps tiles (and the two v7x
        # TensorCores under "parallel" sharding) statistically independent.
        pltpu.prng_seed(seed_ref[0], pl.program_id(0))

        rows, lanes = x_ref.shape        # static block shape
        half = rows // 2                 # block rows are even by construction
        cd = compute_dtype

        # Two independent half-tile draws instead of one full-tile draw that
        # is then sliced: keeps bits/uniform temporaries strip-mined in vregs.
        bits1 = pltpu.bitcast(pltpu.prng_random_bits((half, lanes)), jnp.uint32)
        bits2 = pltpu.bitcast(pltpu.prng_random_bits((half, lanes)), jnp.uint32)
        u1 = _uniform_from_bits(bits1, avoid_zero=True)
        u2 = _uniform_from_bits(bits2, avoid_zero=False)

        # Box-Muller using BOTH outputs (cos -> top half, sin -> bottom half);
        # sigma folded into r once per pair.
        sigma_c = w_ref[0].astype(cd)    # num_parameters == 1 -> scalar sigma
        r = jnp.sqrt(jnp.asarray(-2.0, cd) * jnp.log(u1.astype(cd)))
        sr = sigma_c * r
        theta = jnp.asarray(2.0 * math.pi, cd) * u2.astype(cd)
        n_top = (sr * jnp.cos(theta)).astype(jnp.float32)
        n_bot = (sr * jnp.sin(theta)).astype(jnp.float32)

        # relu computed per half (no full-tile relu_x temporary).
        top = jnp.maximum(x_ref[:half, :].astype(jnp.float32), 0.0) + n_top
        bot = jnp.maximum(x_ref[half:, :].astype(jnp.float32), 0.0) + n_bot
        o_ref[:half, :] = top.astype(o_ref.dtype)
        o_ref[half:, :] = bot.astype(o_ref.dtype)

    return kernel


def _sigma_eps_kernel(w_ref, x_ref, e_ref, o_ref):
    # Portable fallback (non-TPU backends): eps pre-drawn outside the kernel.
    out = jnp.maximum(x_ref[...].astype(jnp.float32), 0.0) + w_ref[0] * e_ref[...]
    o_ref[...] = out.astype(o_ref.dtype)


def trainable_sigma_forward(x, weight, seed):
    """forward(x) = relu(x) + weight * eps, eps ~ N(0, 1).

    x: float array of any shape (e.g. NCHW).  weight: (1,) float32
    (num_parameters == 1).  seed: int controlling the noise draw.
    """
    # TODO(synk): only the default num_parameters == 1 (scalar sigma) case is
    # implemented; num_parameters > 1 relies on PyTorch trailing-dim broadcast.
    orig_shape = x.shape
    if not jnp.issubdtype(x.dtype, jnp.floating):
        x = x.astype(jnp.float32)
    total = x.size

    lanes, rows, pad = _choose_slab(total)
    flat = x.reshape(-1)
    if pad:
        flat = jnp.pad(flat, (0, pad))
    x2 = flat.reshape(rows, lanes)

    row_tile = _pick_row_tile(rows)
    grid = (pl.cdiv(rows, row_tile),)
    blk = pl.BlockSpec((row_tile, lanes), lambda i: (i, 0))
    weight = jnp.asarray(weight, jnp.float32).reshape(-1)

    if jax.default_backend() == "tpu":
        # bf16 Box-Muller chain only on chips with a native bf16 EUP.
        kind = jax.devices()[0].device_kind.lower()
        compute_dtype = jnp.bfloat16 if any(t in kind for t in ("v6", "v7")) \
            else jnp.float32
        seed_arr = jnp.asarray([seed], dtype=jnp.int32)
        out2 = pl.pallas_call(
            _make_sigma_prng_kernel(compute_dtype),
            out_shape=jax.ShapeDtypeStruct(x2.shape, x2.dtype),
            grid=grid,
            in_specs=[
                pl.BlockSpec(memory_space=pltpu.MemorySpace.SMEM),  # seed (1,)
                pl.BlockSpec(memory_space=pltpu.MemorySpace.SMEM),  # weight (1,)
                blk,                                                # x slab
            ],
            out_specs=blk,
            # Alias only when the slab is a fresh padded intermediate; aliasing
            # a plain reshape of the caller's x would force a defensive copy.
            input_output_aliases=({2: 0} if pad else {}),
            compiler_params=pltpu.CompilerParams(
                dimension_semantics=("parallel",),
                vmem_limit_bytes=32 * 1024 * 1024),
        )(seed_arr, weight, x2)
    else:
        eps2 = jax.random.normal(jax.random.PRNGKey(seed), x2.shape, jnp.float32)
        out2 = pl.pallas_call(
            _sigma_eps_kernel,
            out_shape=jax.ShapeDtypeStruct(x2.shape, x2.dtype),
            grid=grid,
            in_specs=[
                pl.BlockSpec(memory_space=pltpu.MemorySpace.SMEM),  # weight (1,)
                blk,                                                # x slab
                blk,                                                # eps slab
            ],
            out_specs=blk,
        )(weight, x2, eps2)

    out_flat = out2.reshape(-1)
    if pad:
        out_flat = out_flat[:total]
    return out_flat.reshape(orig_shape)


if __name__ == "__main__":
    key = jax.random.PRNGKey(0)

    # Small NCHW input consistent with a ProbAct activation layer.
    N, C, H, W = 2, 4, 16, 16
    x = jax.random.normal(key, (N, C, H, W), dtype=jnp.float32)
    weight = jnp.full((1,), 0.5, dtype=jnp.float32)   # num_parameters=1, sigma=0.5

    out = jax.block_until_ready(trainable_sigma_forward(x, weight, seed=1234))
    assert out.shape == (N, C, H, W)
    assert out.dtype == jnp.float32
    assert bool(jnp.all(jnp.isfinite(out)))

    # With weight = 0 the kernel must reproduce relu(x) exactly.
    out_zero = jax.block_until_ready(
        trainable_sigma_forward(x, jnp.zeros((1,), jnp.float32), seed=1234))
    assert bool(jnp.allclose(out_zero, jnp.maximum(x, 0.0)))

    # Multi-step grid path + noise statistics: zeros input, sigma=1 -> output
    # is pure eps, which should be ~N(0, 1).
    xz = jnp.zeros((8, 32, 32, 32), jnp.float32)
    noise = jax.block_until_ready(
        trainable_sigma_forward(xz, jnp.ones((1,), jnp.float32), seed=7))
    assert bool(jnp.all(jnp.isfinite(noise)))
    mean = float(jnp.mean(noise))
    std = float(jnp.std(noise))
    assert abs(mean) < 0.05, mean
    assert abs(std - 1.0) < 0.1, std

    # Awkward (non-128-multiple) shape exercising the minimal-pad path.
    x_odd = jax.random.normal(jax.random.PRNGKey(1), (3, 5, 7), dtype=jnp.float32)
    out_odd = jax.block_until_ready(trainable_sigma_forward(x_odd, weight, seed=3))
    assert out_odd.shape == (3, 5, 7)
    assert bool(jnp.all(jnp.isfinite(out_odd)))
    out_odd0 = jax.block_until_ready(
        trainable_sigma_forward(x_odd, jnp.zeros((1,), jnp.float32), seed=3))
    assert bool(jnp.allclose(out_odd0, jnp.maximum(x_odd, 0.0)))

    print("KERNEL_OK")
</pallas_src>

<mosaic_0001>
module attributes {stable_mosaic.version = 11 : i64} {
  func.func @_sigma_eps_kernel(%arg0: i32, %arg1: memref<1xf32, #tpu.memory_space<smem>>, %arg2: memref<16x128xf32, #tpu.memory_space<vmem>>, %arg3: memref<16x128xf32, #tpu.memory_space<vmem>>, %arg4: memref<16x128xf32, #tpu.memory_space<vmem>>) attributes {dimension_semantics = [#tpu.dimension_semantics<arbitrary>], iteration_bounds = array<i64: 1>, scalar_prefetch = 0 : i64, scratch_operands = 0 : i64, tpu.core_type = #tpu.core_type<tc>, window_params = [{transform_indices = @transform_0, window_bounds = array<i64: 1>}, {transform_indices = @transform_1, window_bounds = array<i64: 16, 128>}, {transform_indices = @transform_2, window_bounds = array<i64: 16, 128>}, {transform_indices = @transform_3, window_bounds = array<i64: 16, 128>}]} {
    %c0 = arith.constant 0 : index
    %c0_0 = arith.constant 0 : index
    %0 = vector.load %arg2[%c0, %c0_0] : memref<16x128xf32, #tpu.memory_space<vmem>>, vector<16x128xf32>
    %cst = arith.constant 0.000000e+00 : f32
    %1 = vector.broadcast %cst : f32 to vector<16x128xf32>
    %2 = arith.maximumf %0, %1 : vector<16x128xf32>
    %c0_1 = arith.constant 0 : index
    %3 = memref.load %arg1[%c0_1] : memref<1xf32, #tpu.memory_space<smem>>
    %c0_2 = arith.constant 0 : index
    %c0_3 = arith.constant 0 : index
    %4 = vector.load %arg3[%c0_2, %c0_3] : memref<16x128xf32, #tpu.memory_space<vmem>>, vector<16x128xf32>
    %5 = vector.broadcast %3 : f32 to vector<16x128xf32>
    %6 = arith.mulf %5, %4 : vector<16x128xf32>
    %7 = arith.addf %2, %6 : vector<16x128xf32>
    %c0_4 = arith.constant 0 : index
    %c0_5 = arith.constant 0 : index
    %8 = vector.load %arg4[%c0_4, %c0_5] : memref<16x128xf32, #tpu.memory_space<vmem>>, vector<16x128xf32>
    tpu.vector_store %arg4[%c0_4, %c0_5], %7 {strides = array<i32>} : memref<16x128xf32, #tpu.memory_space<vmem>>, vector<16x128xf32>,
    return
  }
  func.func @transform_0(%arg0: i32) -> i32 {
    %c0_i32 = arith.constant 0 : i32
    %c0_i32_0 = arith.constant 0 : i32
    return %c0_i32 : i32
  }
  func.func @transform_1(%arg0: i32) -> (i32, i32) {
    %c0_i32 = arith.constant 0 : i32
    %c0_i32_0 = arith.constant 0 : i32
    return %arg0, %c0_i32 : i32, i32
  }
  func.func @transform_2(%arg0: i32) -> (i32, i32) {
    %c0_i32 = arith.constant 0 : i32
    %c0_i32_0 = arith.constant 0 : i32
    return %arg0, %c0_i32 : i32, i32
  }
  func.func @transform_3(%arg0: i32) -> (i32, i32) {
    %c0_i32 = arith.constant 0 : i32
    %c0_i32_0 = arith.constant 0 : i32
    return %arg0, %c0_i32 : i32, i32
  }
}

</mosaic_0001>

<bundles_post_ra>
// kernel: tpu_custom_call.1
= control target key start
LH: loop header
LB: loop body
LE: loop exit
PB: predicated region body
PF: predicated region fallthrough
CT: control target
= control target key end

     0   :  { %9 = vsyncpa [#allocation4], 0  ;;  %s226_s0 = inlined_call_operand.<no memory space> [shape: f32[1], index: 0, kind: input, shape index: {}]   ;;  %s227_s1 = inlined_call_operand.hbm [shape: f32[16,128], index: 1, kind: input, shape index: {}]   ;;  %s228_s2 = inlined_call_operand.hbm [shape: f32[16,128], index: 2, kind: input, shape index: {}]   ;;  %s229_s3 = inlined_call_operand.hbm [shape: f32[16,128], index: 3, kind: output, shape index: {}]  }
   0x1   :  { %10 = vsyncpa [#allocation7], 0 }
   0x2   :  { %11 = vsyncpa [#allocation5], 0  ;;  %s153_s12 = smov [#allocation3]   ;;  %s81_s16 = scalar_lea.hbm %s227_s1, 256 }
   0x3   :  { %s19_s13 = sshll.u32 %s153_s12, 4  ;;  %p82_p0 = scmp.ne.s32.totalorder %s227_s1, %s81_s16  ;;  %s20_s13 = int_to_ptr.vmem [resolvable:$true] %s19_s13 }
   0x4   :  { %p85_p1 = scmp.lt.u32.totalorder %s81_s16, %s227_s1 }
   0x6   :  { %p87_p2 = pnand %p85_p1, %p82_p0 }
   0x8   :  { %90 = shalt.err (!%p87_p2)
}
   0x9   :  { %s91_s21 = scalar_lea.vmem %s20_s13, 256  ;;  %p96_p4 = scmp.lt.s32.totalorder %s20_s13, %s20_s13 }
   0xa   :  { %p92_p3 = scmp.ne.s32.totalorder %s20_s13, %s91_s21  ;;  %p97_p5 = scmp.lt.s32.totalorder %s91_s21, %s91_s21 }
   0xc   :  { %p98_p6 = por %p97_p5, %p96_p4 }
   0xe   :  { %p99_p7 = pnand %p98_p6, %p92_p3 }
  0x10   :  { %102 = shalt.err (!%p99_p7)
}
  0x11   :  { %s154_s22 = smov 128   ;;  %s155_s23 = smov 8  }
  0x12   :  { %25 = dma.hbm_to_vmem [thread:$0]  %s227_s1, 256, %s20_s13, [#allocation4], %s154_s22, %s154_s22, %s155_s23  }
  0x13   :  { %s156_s26 = smov [#allocation6]   ;;  %s103_s30 = scalar_lea.hbm %s228_s2, 256 }
  0x14   :  { %s31_s27 = sshll.u32 %s156_s26, 4  ;;  %p104_p8 = scmp.ne.s32.totalorder %s228_s2, %s103_s30  ;;  %s32_s27 = int_to_ptr.vmem [resolvable:$true] %s31_s27 }
  0x15   :  { %p107_p9 = scmp.lt.u32.totalorder %s103_s30, %s228_s2 }
  0x17   :  { %p109_p10 = pnand %p107_p9, %p104_p8 }
  0x19   :  { %112 = shalt.err (!%p109_p10)
}
  0x1a   :  { %s113_s8 = scalar_lea.vmem %s32_s27, 256  ;;  %p118_p12 = scmp.lt.s32.totalorder %s32_s27, %s32_s27 }
  0x1b   :  { %p114_p11 = scmp.ne.s32.totalorder %s32_s27, %s113_s8  ;;  %p119_p13 = scmp.lt.s32.totalorder %s113_s8, %s113_s8 }
  0x1d   :  { %p120_p0 = por %p119_p13, %p118_p12 }
  0x1f   :  { %p121_p1 = pnand %p120_p0, %p114_p11 }
  0x21   :  { %124 = shalt.err (!%p121_p1)
}
  0x22   :  { %37 = dma.hbm_to_vmem [thread:$0]  %s228_s2, 256, %s32_s27, [#allocation7], %s154_s22, %s154_s22, %s155_s23  }
  0x23   :  { %147 = dma.done.wait [#allocation4], 256  }
  0x24   :  { %148 = vsyncadd [#allocation4], 4294967040 }
  0x25   :  { %149 = dma.done.wait [#allocation7], 256  }
  0x26   :  { %150 = vsyncadd [#allocation7], 4294967040  ;;  %v51_v0 = vstv %s226_s0  ;;  %v44_v1 = vld [vmem:[#allocation3] sm:$0xff]  ;;  %v49_v2 = vld [vmem:[#allocation6] sm:$0xff]  ;;  %s157_s12 = smov [#allocation8]  }
  0x27   :  { %v45_v3 = vld [vmem:[#allocation3 + $0x8] sm:$0xff]  ;;  %v46_v4 = vmax.f32 %v44_v1, 0.0  ;;  %v52_v5 = vmul.f32 %v51_v0, %v49_v2  ;;  %v50_v7 = vld [vmem:[#allocation6 + $0x8] sm:$0xff]  ;;  %s63_s13 = sshll.u32 %s157_s12, 4  ;;  %s64_s13 = int_to_ptr.vmem [resolvable:$true] %s63_s13 }
  0x28   :  { %v47_v6 = vmax.f32 %v45_v3, 0.0  ;;  %v53_v8 = vmul.f32 %v51_v0, %v50_v7  ;;  %s125_s2 = scalar_lea.vmem %s64_s13, 256  ;;  %p130_p3 = scmp.lt.s32.totalorder %s64_s13, %s64_s13 }
  0x29   :  { %v54_v9 = vadd.f32 %v52_v5, %v46_v4  ;;  %p126_p2 = scmp.ne.s32.totalorder %s64_s13, %s125_s2  ;;  %p131_p4 = scmp.lt.s32.totalorder %s125_s2, %s125_s2 }
  0x2a   :  { %v55_v10 = vadd.f32 %v53_v8, %v47_v6 }
  0x2b   :  { %56 = vst [vmem:[#allocation8] sm:$0xff] %v54_v9  ;;  %p132_p5 = por %p131_p4, %p130_p3 }
  0x2c   :  { %57 = vst [vmem:[#allocation8 + $0x8] sm:$0xff] %v55_v10 }
  0x2d   :  { %p133_p6 = pnand %p132_p5, %p126_p2 }
  0x2f   :  { %136 = shalt.err (!%p133_p6)
}
  0x30   :  { %s137_s15 = scalar_lea.hbm %s229_s3, 256 }
  0x31   :  { %p138_p7 = scmp.ne.s32.totalorder %s229_s3, %s137_s15  ;;  %p141_p8 = scmp.lt.u32.totalorder %s137_s15, %s229_s3 }
  0x33   :  { %p143_p9 = pnand %p141_p8, %p138_p7 }
  0x35   :  { %146 = shalt.err (!%p143_p9)
}
  0x36   :  { %69 = dma.vmem_to_hbm [thread:$0]  %s64_s13, 256, %s229_s3, [#allocation5], %s154_s22, %s154_s22, %s155_s23  }
  0x37   :  { %151 = dma.done.wait [#allocation5], 256  }
  0x38   :  { %152 = vsyncadd [#allocation5], 4294967040 }
  0x39   :  { %73 = vsyncpa [#allocation4], 1 }
  0x3a   :  { %74 = vsyncpa [#allocation7], 1 }
  0x3b   :  { %75 = vsyncpa [#allocation5], 1 }

</bundles_post_ra>
